<compile_context>
chip_gen: v5e
topology: v5e:2x2
jax: 0.10.0
libtpu: 0.0.40
codegen_flags: <defaults>
</compile_context>

<pallas_src>
import functools

import jax
import jax.numpy as jnp
import numpy as np
from jax.experimental import pallas as pl
from jax.experimental.pallas import tpu as pltpu


def _round_up(x, m):
    return ((x + m - 1) // m) * m


def _choose_block_rows(b_rows, max_block_rows, min_grid_steps=2):
    """Per-step batch-tile height (always a multiple of 8 sublanes).

    Big tiles amortize the ~0.35 us/step pipeline overhead; when the batch is large
    enough we keep >= `min_grid_steps` grid steps so v7x's two TensorCores both get
    work under dimension_semantics=("parallel",) (no effect on v5e/v6e).
    """
    tb = min(max_block_rows, b_rows)
    if b_rows // tb < min_grid_steps and b_rows >= 8 * min_grid_steps:
        tb = max(8, ((b_rows // min_grid_steps) // 8) * 8)
    return tb


def ddqn2_heads_kernel(feat_ref, wbig_ref, wlin_ref, bias_ref, val_ref, out_ref,
                       *, a_pad, inv_num_actions):
    feat = feat_ref[...]                          # (TB, C*HW), compute dtype (bf16)
    val = val_ref[...]                            # (TB, 1) f32

    # Both heads' 1x1 convs (no bias) + ReLU as one fat matmul; columns are in
    # PyTorch NCHW Flatten order per head: [pick o*HW+p | place o*HW+p].
    h = jnp.maximum(
        jnp.dot(feat, wbig_ref[...], preferred_element_type=jnp.float32), 0.0)

    # Both heads' advantage Linears as one block-diagonal matmul (K=4*HW, N=2*A_pad),
    # f32 accumulation, merged f32 bias add.
    adv = jnp.dot(h.astype(wlin_ref.dtype), wlin_ref[...],
                  preferred_element_type=jnp.float32) + bias_ref[...]

    # Dueling combine, per head, over the TRUE action count: padded weight/bias lanes
    # are zero so padded adv lanes are exactly 0 and don't perturb the sums.
    mean_p = jnp.sum(adv[:, :a_pad], axis=-1, keepdims=True) * inv_num_actions
    mean_q = jnp.sum(adv[:, a_pad:], axis=-1, keepdims=True) * inv_num_actions
    lane = jax.lax.broadcasted_iota(jnp.int32, adv.shape, 1)
    mean = jnp.where(lane < a_pad, mean_p, mean_q)

    out_ref[...] = val + adv - mean               # single unmasked (TB, 2*A_pad) store


def prepare_ddqn2_head_params(pick_conv_w, pick_lin_w, pick_lin_b,
                              place_conv_w, place_lin_w, place_lin_b,
                              *, compute_dtype=jnp.bfloat16):
    """Fold both DDQN_pp heads' parameters into merged kernel weights ONCE at
    parameter-load time (not per forward call)."""
    out_ch, C, kh, kw = pick_conv_w.shape
    assert (out_ch, kh, kw) == (2, 1, 1)
    A, two_hw = pick_lin_w.shape
    HW = two_hw // 2
    assert 2 * HW == two_hw
    # TODO(synk): the conv-as-block-diagonal-matmul trick inflates the first weight by a
    # factor of HW; for boards with HW >> 64 switch to an NHWC formulation contracting
    # only over C instead.
    if HW > 64:
        raise NotImplementedError(
            "block-diagonal 1x1-conv weight only intended for small H*W")
    A_pad = _round_up(A, 128)

    eye = jnp.eye(HW, dtype=jnp.float32)

    def conv_cols(conv_w):
        wc = conv_w.reshape(2, C).astype(jnp.float32)            # (out_ch=2, in_ch=C)
        # Wbig[c*HW + p, o*HW + q] = wc[o, c] * I[p, q]  (PyTorch NCHW Flatten order)
        return jnp.einsum("oc,pq->cpoq", wc, eye).reshape(C * HW, 2 * HW)

    # Merged conv-as-matmul weight: columns [0:2HW) = pick head, [2HW:4HW) = place head.
    wbig = jnp.concatenate(
        [conv_cols(pick_conv_w), conv_cols(place_conv_w)], axis=1
    ).astype(compute_dtype)                                      # (C*HW, 4*HW)

    # Block-diagonal merged Linear weight: pick rows -> lanes [0:A), place rows -> [A_pad:A_pad+A).
    wlin = jnp.zeros((4 * HW, 2 * A_pad), jnp.float32)
    wlin = wlin.at[:2 * HW, :A].set(pick_lin_w.T.astype(jnp.float32))
    wlin = wlin.at[2 * HW:, A_pad:A_pad + A].set(place_lin_w.T.astype(jnp.float32))
    wlin = wlin.astype(compute_dtype)                            # (4*HW, 2*A_pad)

    bias = jnp.zeros((1, 2 * A_pad), jnp.float32)
    bias = bias.at[0, :A].set(pick_lin_b.astype(jnp.float32))
    bias = bias.at[0, A_pad:A_pad + A].set(place_lin_b.astype(jnp.float32))

    return dict(wbig=wbig, wlin=wlin, bias=bias, num_actions=A, a_pad=A_pad,
                num_filters=C, hw=HW, compute_dtype=compute_dtype)


def ddqn2_heads_forward(features, value, params, *, max_block_rows=512):
    """features: (B, C, H, W) NCHW trunk output; value: (B, 1) value-head output.
    Returns (pick, place), each (B, num_actions) float32."""
    B, C, H, W = features.shape
    HW = H * W
    assert C == params["num_filters"] and HW == params["hw"]
    A, A_pad = params["num_actions"], params["a_pad"]
    compute_dtype = params["compute_dtype"]

    feat2d = features.reshape(B, C * HW).astype(compute_dtype)   # lane-dense NCHW flatten
    val2d = value.reshape(B, 1).astype(jnp.float32)

    # Batch blocking: pad rows to full 8-sublane vregs, then to a whole number of tiles.
    b8 = _round_up(B, 8)
    TB = _choose_block_rows(b8, max_block_rows)
    B_pad = _round_up(b8, TB)
    if B_pad != B:
        feat2d = jnp.pad(feat2d, ((0, B_pad - B), (0, 0)))
        val2d = jnp.pad(val2d, ((0, B_pad - B), (0, 0)))

    kernel = functools.partial(ddqn2_heads_kernel, a_pad=A_pad, inv_num_actions=1.0 / A)

    # Conservative double-buffered VMEM estimate; only raise the scoped limit when it
    # would not comfortably fit the smallest default (16 MiB on v5e).
    itemsize = jnp.dtype(compute_dtype).itemsize
    vmem_est = 2 * (TB * C * HW * itemsize               # feature slab
                    + TB * 2 * A_pad * 4                 # merged output slab (f32)
                    + TB * 4                             # value rows
                    + params["wbig"].size * itemsize
                    + params["wlin"].size * itemsize
                    + params["bias"].size * 4)
    cp_kwargs = dict(dimension_semantics=("parallel",))
    if vmem_est > 12 * 1024 * 1024:
        cp_kwargs["vmem_limit_bytes"] = int(vmem_est + 8 * 1024 * 1024)

    out = pl.pallas_call(
        kernel,
        out_shape=jax.ShapeDtypeStruct((B_pad, 2 * A_pad), jnp.float32),
        grid=(B_pad // TB,),
        in_specs=[
            pl.BlockSpec((TB, C * HW), lambda i: (i, 0)),         # features (lane-dense)
            pl.BlockSpec((C * HW, 4 * HW), lambda i: (0, 0)),     # merged conv-as-matmul weight
            pl.BlockSpec((4 * HW, 2 * A_pad), lambda i: (0, 0)),  # merged block-diag Linear weight
            pl.BlockSpec((1, 2 * A_pad), lambda i: (0, 0)),       # merged bias (f32)
            pl.BlockSpec((TB, 1), lambda i: (i, 0)),              # value rows
        ],
        out_specs=pl.BlockSpec((TB, 2 * A_pad), lambda i: (i, 0)),
        compiler_params=pltpu.CompilerParams(**cp_kwargs),
    )(feat2d, params["wbig"], params["wlin"], params["bias"], val2d)

    return out[:B, :A], out[:B, A_pad:A_pad + A]


def ddqn_pp_reference(features, value, conv_w, lin_w, lin_b):
    """Pure-JAX f32 reference matching the PyTorch DDQN_pp head exactly."""
    B, C, H, W = features.shape
    wc = conv_w.reshape(2, C)
    conv = jnp.einsum("bchw,oc->bohw", features, wc)             # 1x1 conv, no bias
    h = jnp.maximum(conv, 0.0)                                   # ReLU
    flat = h.reshape(B, 2 * H * W)                               # PyTorch Flatten (channel-major)
    adv = flat @ lin_w.T + lin_b                                 # Linear
    return value + adv - jnp.mean(adv, axis=-1, keepdims=True)


if __name__ == "__main__":
    # Small, deterministic shapes consistent with the module:
    # num_filters (C) = 32, conv_out (H*W) = 16, num_actions (A) = 8, batch = 2.
    B, C, H, W, A = 2, 32, 4, 4, 8

    key = jax.random.PRNGKey(0)
    (k_feat, k_val, k_cw_p, k_lw_p, k_lb_p, k_cw_q, k_lw_q, k_lb_q) = jax.random.split(key, 8)

    features = jax.random.normal(k_feat, (B, C, H, W), dtype=jnp.float32)
    value = jax.random.normal(k_val, (B, 1), dtype=jnp.float32)

    pick_conv_w = jax.random.normal(k_cw_p, (2, C, 1, 1), dtype=jnp.float32) * 0.1
    pick_lin_w = jax.random.normal(k_lw_p, (A, 2 * H * W), dtype=jnp.float32) * 0.1
    pick_lin_b = jax.random.normal(k_lb_p, (A,), dtype=jnp.float32) * 0.1

    place_conv_w = jax.random.normal(k_cw_q, (2, C, 1, 1), dtype=jnp.float32) * 0.1
    place_lin_w = jax.random.normal(k_lw_q, (A, 2 * H * W), dtype=jnp.float32) * 0.1
    place_lin_b = jax.random.normal(k_lb_q, (A,), dtype=jnp.float32) * 0.1

    # Parameter folding happens once, at load time.
    params = prepare_ddqn2_head_params(
        pick_conv_w, pick_lin_w, pick_lin_b,
        place_conv_w, place_lin_w, place_lin_b,
    )

    out_pick, out_place = ddqn2_heads_forward(features, value, params)
    out_pick = jax.block_until_ready(out_pick)
    out_place = jax.block_until_ready(out_place)

    ref_pick = ddqn_pp_reference(features, value, pick_conv_w, pick_lin_w, pick_lin_b)
    ref_place = ddqn_pp_reference(features, value, place_conv_w, place_lin_w, place_lin_b)

    # bf16 feature/weight path -> loosened tolerance vs. the f32 reference.
    np.testing.assert_allclose(np.asarray(out_pick), np.asarray(ref_pick), rtol=3e-2, atol=3e-2)
    np.testing.assert_allclose(np.asarray(out_place), np.asarray(ref_place), rtol=3e-2, atol=3e-2)

    print("KERNEL_OK")
</pallas_src>

<mosaic_0001>
module attributes {stable_mosaic.version = 11 : i64} {
  func.func @ddqn2_heads_kernel(%arg0: i32, %arg1: memref<8x512xbf16, #tpu.memory_space<vmem>>, %arg2: memref<512x64xbf16, #tpu.memory_space<vmem>>, %arg3: memref<64x256xbf16, #tpu.memory_space<vmem>>, %arg4: memref<1x256xf32, #tpu.memory_space<vmem>>, %arg5: memref<8x1xf32, #tpu.memory_space<vmem>>, %arg6: memref<8x256xf32, #tpu.memory_space<vmem>>) attributes {dimension_semantics = [#tpu.dimension_semantics<parallel>], iteration_bounds = array<i64: 1>, scalar_prefetch = 0 : i64, scratch_operands = 0 : i64, tpu.core_type = #tpu.core_type<tc>, window_params = [{transform_indices = @transform_0, window_bounds = array<i64: 8, 512>}, {pipeline_mode = #tpu.pipeline_mode<synchronous>, transform_indices = @transform_1, window_bounds = array<i64: 512, 64>}, {pipeline_mode = #tpu.pipeline_mode<synchronous>, transform_indices = @transform_2, window_bounds = array<i64: 64, 256>}, {pipeline_mode = #tpu.pipeline_mode<synchronous>, transform_indices = @transform_3, window_bounds = array<i64: 1, 256>}, {transform_indices = @transform_4, window_bounds = array<i64: 8, 1>}, {transform_indices = @transform_5, window_bounds = array<i64: 8, 256>}]} {
    %c0 = arith.constant 0 : index
    %c0_0 = arith.constant 0 : index
    %0 = vector.load %arg1[%c0, %c0_0] : memref<8x512xbf16, #tpu.memory_space<vmem>>, vector<8x512xbf16>
    %c0_1 = arith.constant 0 : index
    %c0_2 = arith.constant 0 : index
    %1 = vector.load %arg5[%c0_1, %c0_2] : memref<8x1xf32, #tpu.memory_space<vmem>>, vector<8x1xf32>
    %c0_3 = arith.constant 0 : index
    %c0_4 = arith.constant 0 : index
    %2 = vector.load %arg2[%c0_3, %c0_4] : memref<512x64xbf16, #tpu.memory_space<vmem>>, vector<512x64xbf16>
    %cst = arith.constant dense<0.000000e+00> : vector<8x64xf32>
    %3 = tpu.matmul %0, %2, %cst {dimension_numbers = #tpu.dot_dimension_numbers<[1], [0], [0], [1], [0, 0, 1, 1], [], []>} : vector<8x512xbf16>, vector<512x64xbf16>, vector<8x64xf32> -> vector<8x64xf32>
    %cst_5 = arith.constant 0.000000e+00 : f32
    %4 = vector.broadcast %cst_5 : f32 to vector<8x64xf32>
    %5 = arith.maximumf %3, %4 : vector<8x64xf32>
    %6 = arith.truncf %5 : vector<8x64xf32> to vector<8x64xbf16>
    %c0_6 = arith.constant 0 : index
    %c0_7 = arith.constant 0 : index
    %7 = vector.load %arg3[%c0_6, %c0_7] : memref<64x256xbf16, #tpu.memory_space<vmem>>, vector<64x256xbf16>
    %cst_8 = arith.constant dense<0.000000e+00> : vector<8x256xf32>
    %8 = tpu.matmul %6, %7, %cst_8 {dimension_numbers = #tpu.dot_dimension_numbers<[1], [0], [0], [1], [0, 0, 1, 1], [], []>} : vector<8x64xbf16>, vector<64x256xbf16>, vector<8x256xf32> -> vector<8x256xf32>
    %c0_9 = arith.constant 0 : index
    %c0_10 = arith.constant 0 : index
    %9 = vector.load %arg4[%c0_9, %c0_10] : memref<1x256xf32, #tpu.memory_space<vmem>>, vector<1x256xf32>
    %10 = vector.broadcast %9 : vector<1x256xf32> to vector<8x256xf32>
    %11 = arith.addf %8, %10 : vector<8x256xf32>
    %12 = vector.extract_strided_slice %11 {offsets = [0, 0], sizes = [8, 128], strides = [1, 1]} : vector<8x256xf32> to vector<8x128xf32>
    %cst_11 = arith.constant dense<0.000000e+00> : vector<8xf32>
    %13 = vector.multi_reduction <add>, %12, %cst_11 [1] : vector<8x128xf32> to vector<8xf32>
    %14 = vector.shape_cast %13 : vector<8xf32> to vector<8x1xf32>
    %cst_12 = arith.constant 1.250000e-01 : f32
    %15 = vector.broadcast %cst_12 : f32 to vector<8x1xf32>
    %16 = arith.mulf %14, %15 : vector<8x1xf32>
    %17 = vector.extract_strided_slice %11 {offsets = [0, 128], sizes = [8, 128], strides = [1, 1]} : vector<8x256xf32> to vector<8x128xf32>
    %cst_13 = arith.constant dense<0.000000e+00> : vector<8xf32>
    %18 = vector.multi_reduction <add>, %17, %cst_13 [1] : vector<8x128xf32> to vector<8xf32>
    %19 = vector.shape_cast %18 : vector<8xf32> to vector<8x1xf32>
    %cst_14 = arith.constant 1.250000e-01 : f32
    %20 = vector.broadcast %cst_14 : f32 to vector<8x1xf32>
    %21 = arith.mulf %19, %20 : vector<8x1xf32>
    %22 = tpu.iota {dimensions = array<i32: 1>} : vector<8x256xi32>
    %c128_i32 = arith.constant 128 : i32
    %23 = vector.broadcast %c128_i32 : i32 to vector<8x256xi32>
    %24 = arith.cmpi slt, %22, %23 : vector<8x256xi32>
    %25 = vector.shape_cast %16 : vector<8x1xf32> to vector<8x1xf32>
    %26 = vector.broadcast %25 : vector<8x1xf32> to vector<8x256xf32>
    %27 = vector.shape_cast %21 : vector<8x1xf32> to vector<8x1xf32>
    %28 = vector.broadcast %27 : vector<8x1xf32> to vector<8x256xf32>
    %29 = arith.select %24, %26, %28 : vector<8x256xi1>, vector<8x256xf32>
    %30 = vector.broadcast %1 : vector<8x1xf32> to vector<8x256xf32>
    %31 = arith.addf %30, %11 : vector<8x256xf32>
    %32 = arith.subf %31, %29 : vector<8x256xf32>
    %c0_15 = arith.constant 0 : index
    %c0_16 = arith.constant 0 : index
    %33 = vector.load %arg6[%c0_15, %c0_16] : memref<8x256xf32, #tpu.memory_space<vmem>>, vector<8x256xf32>
    tpu.vector_store %arg6[%c0_15, %c0_16], %32 {strides = array<i32>} : memref<8x256xf32, #tpu.memory_space<vmem>>, vector<8x256xf32>,
    return
  }
  func.func @transform_0(%arg0: i32) -> (i32, i32) {
    %c0_i32 = arith.constant 0 : i32
    %c0_i32_0 = arith.constant 0 : i32
    return %arg0, %c0_i32 : i32, i32
  }
  func.func @transform_1(%arg0: i32) -> (i32, i32) {
    %c0_i32 = arith.constant 0 : i32
    %c0_i32_0 = arith.constant 0 : i32
    %c0_i32_1 = arith.constant 0 : i32
    return %c0_i32, %c0_i32_0 : i32, i32
  }
  func.func @transform_2(%arg0: i32) -> (i32, i32) {
    %c0_i32 = arith.constant 0 : i32
    %c0_i32_0 = arith.constant 0 : i32
    %c0_i32_1 = arith.constant 0 : i32
    return %c0_i32, %c0_i32_0 : i32, i32
  }
  func.func @transform_3(%arg0: i32) -> (i32, i32) {
    %c0_i32 = arith.constant 0 : i32
    %c0_i32_0 = arith.constant 0 : i32
    %c0_i32_1 = arith.constant 0 : i32
    return %c0_i32, %c0_i32_0 : i32, i32
  }
  func.func @transform_4(%arg0: i32) -> (i32, i32) {
    %c0_i32 = arith.constant 0 : i32
    %c0_i32_0 = arith.constant 0 : i32
    return %arg0, %c0_i32 : i32, i32
  }
  func.func @transform_5(%arg0: i32) -> (i32, i32) {
    %c0_i32 = arith.constant 0 : i32
    %c0_i32_0 = arith.constant 0 : i32
    return %arg0, %c0_i32 : i32, i32
  }
}

</mosaic_0001>

<bundles_post_ra>
// kernel: tpu_custom_call.1
= control target key start
LH: loop header
LB: loop body
LE: loop exit
PB: predicated region body
PF: predicated region fallthrough
CT: control target
= control target key end

     0   :  { %s896_s0 = inlined_call_operand.vmem [shape: bf16[8,512], index: 0, kind: input, shape index: {}]   ;;  %s897_s1 = inlined_call_operand.vmem [shape: bf16[512,64], index: 1, kind: input, shape index: {}]   ;;  %s898_s2 = inlined_call_operand.vmem [shape: bf16[64,256], index: 2, kind: input, shape index: {}]   ;;  %s899_s3 = inlined_call_operand.vmem [shape: f32[1,256], index: 3, kind: input, shape index: {}]   ;;  %s900_s4 = inlined_call_operand.vmem [shape: f32[8,1], index: 4, kind: input, shape index: {}]   ;;  %s901_s5 = inlined_call_operand.hbm [shape: f32[8,256], index: 5, kind: output, shape index: {}]  }
   0x1   :  { %v642_v0 = vld [vmem:[%s897_s1 + $0x38] sm:$0xff]  ;;  %v641_v4 = vld [vmem:[%s897_s1 + $0x30] sm:$0xff]  ;;  %v640_v8 = vld [vmem:[%s897_s1 + $0x28] sm:$0xff] }
   0x2   :  { %v650_v1 = vld [vmem:[%s897_s1 + $0x78] sm:$0xff]  ;;  %295 = vmatpush.bf16.msra.mxu0 %v642_v0  ;;  %v649_v5 = vld [vmem:[%s897_s1 + $0x70] sm:$0xff]  ;;  %v648_v9 = vld [vmem:[%s897_s1 + $0x68] sm:$0xff] }
   0x3   :  { %v658_v2 = vld [vmem:[%s897_s1 + $0xb8] sm:$0xff]  ;;  %308 = vmatpush.bf16.msra.mxu1 %v650_v1  ;;  %v657_v6 = vld [vmem:[%s897_s1 + $0xb0] sm:$0xff]  ;;  %v656_v10 = vld [vmem:[%s897_s1 + $0xa8] sm:$0xff] }
   0x4   :  { %v666_v3 = vld [vmem:[%s897_s1 + $0xf8] sm:$0xff]  ;;  %321 = vmatpush.bf16.msra.mxu2 %v658_v2  ;;  %v665_v7 = vld [vmem:[%s897_s1 + $0xf0] sm:$0xff]  ;;  %v664_v11 = vld [vmem:[%s897_s1 + $0xe8] sm:$0xff] }
   0x5   :  { %334 = vmatpush.bf16.msra.mxu3 %v666_v3  ;;  %v639_v12 = vld [vmem:[%s897_s1 + $0x20] sm:$0xff] }
   0x6   :  { %296 = vmatpush.bf16.msra.mxu0 %v641_v4  ;;  %v647_v13 = vld [vmem:[%s897_s1 + $0x60] sm:$0xff] }
   0x7   :  { %309 = vmatpush.bf16.msra.mxu1 %v649_v5  ;;  %v655_v14 = vld [vmem:[%s897_s1 + $0xa0] sm:$0xff] }
   0x8   :  { %322 = vmatpush.bf16.msra.mxu2 %v657_v6  ;;  %v663_v15 = vld [vmem:[%s897_s1 + $0xe0] sm:$0xff] }
   0x9   :  { %335 = vmatpush.bf16.msra.mxu3 %v665_v7 }
   0xa   :  { %297 = vmatpush.bf16.msra.mxu0 %v640_v8 }
   0xb   :  { %310 = vmatpush.bf16.msra.mxu1 %v648_v9 }
   0xc   :  { %323 = vmatpush.bf16.msra.mxu2 %v656_v10 }
   0xd   :  { %336 = vmatpush.bf16.msra.mxu3 %v664_v11 }
   0xe   :  { %10 = vsyncpa [#allocation3], 0  ;;  %298 = vmatpush.bf16.msra.mxu0 %v639_v12  ;;  %v638_v16 = vld [vmem:[%s897_s1 + $0x18] sm:$0xff]  ;;  %v637_v20 = vld [vmem:[%s897_s1 + $0x10] sm:$0xff]  ;;  %v705_v3 = vmov 0   ;;  %vm403_vm0 = vcmask 523264  }
   0xf   :  { %311 = vmatpush.bf16.msra.mxu1 %v647_v13  ;;  %v646_v17 = vld [vmem:[%s897_s1 + $0x58] sm:$0xff]  ;;  %v645_v21 = vld [vmem:[%s897_s1 + $0x50] sm:$0xff]  ;;  %v636_v24 = vld [vmem:[%s897_s1 + $0x8] sm:$0xff]  ;;  %677 = vset.pattern.permute.xlu1 %v705_v3  ;;  %s464_s19 = sshll.u32 %s901_s5, 4  ;;  %s465_s19 = int_to_ptr.hbm [resolvable:$true] %s464_s19 }
  0x10   :  { %324 = vmatpush.bf16.msra.mxu2 %v655_v14  ;;  %v654_v18 = vld [vmem:[%s897_s1 + $0x98] sm:$0xff]  ;;  %v653_v22 = vld [vmem:[%s897_s1 + $0x90] sm:$0xff]  ;;  %v644_v25 = vld [vmem:[%s897_s1 + $0x48] sm:$0xff]  ;;  %678 = vset.pattern.permute.xlu0 %v705_v3 }
  0x11   :  { %337 = vmatpush.bf16.msra.mxu3 %v663_v15  ;;  %v662_v19 = vld [vmem:[%s897_s1 + $0xd8] sm:$0xff]  ;;  %v661_v23 = vld [vmem:[%s897_s1 + $0xd0] sm:$0xff]  ;;  %v22_v26 = vld [vmem:[%s896_s0] sm:$0xff] }
  0x12   :  { %299 = vmatpush.bf16.msra.mxu0 %v638_v16  ;;  %v652_v27 = vld [vmem:[%s897_s1 + $0x88] sm:$0xff]  ;;  %v91_v30 = vunpack.c.l.b16 %v22_v26  ;;  %v92_v31 = vunpack.c.h.b16 %v22_v26  ;;  %v627_v32 = vld [vmem:[%s898_s2 + $0x30] sm:$0xf]  ;;  %v674_v33 = vld [vmem:[%s898_s2 + $0x34] sm:$0xf0] }
  0x13   :  { %312 = vmatpush.bf16.msra.mxu1 %v646_v17  ;;  %v660_v28 = vld [vmem:[%s897_s1 + $0xc8] sm:$0xff]  ;;  %v635_v34 = vld [vmem:[%s897_s1] sm:$0xff]  ;;  %v628_v40 = vor.u32 %v674_v33, %v627_v32  ;;  %v673_v45 = vld [vmem:[%s898_s2 + $0x34] sm:$0xf] }
  0x14   :  { %325 = vmatpush.bf16.msra.mxu2 %v654_v18  ;;  %v23_v29 = vld [vmem:[%s896_s0 + $0x8] sm:$0xff]  ;;  %v643_v35 = vld [vmem:[%s897_s1 + $0x40] sm:$0xff]  ;;  %v95_v41 = vpack.c.b16 %v91_v30, %v91_v30  ;;  %v96_v42 = vpack.c.b16 %v92_v31, %v92_v31  ;;  %v629_v46 = vld [vmem:[%s898_s2 + $0x38] sm:$0xf0] }
  0x15   :  { %338 = vmatpush.bf16.msra.mxu3 %v662_v19  ;;  %v93_v36 = vunpack.c.l.b16 %v23_v29  ;;  %v94_v37 = vunpack.c.h.b16 %v23_v29  ;;  %v651_v38 = vld [vmem:[%s897_s1 + $0x80] sm:$0xff]  ;;  %v632_v47 = vor.u32 %v673_v45, %v629_v46  ;;  %v672_v49 = vld [vmem:[%s898_s2 + $0x24] sm:$0xf0]  ;;  %v621_v52 = vld [vmem:[%s898_s2 + $0x28] sm:$0xf0] }
  0x16   :  { %300 = vmatpush.bf16.msra.mxu0 %v637_v20  ;;  %v659_v39 = vld [vmem:[%s897_s1 + $0xc0] sm:$0xff]  ;;  %v611_v54 = vld [vmem:[%s898_s2 + $0x10] sm:$0xf]  ;;  %v670_v55 = vld [vmem:[%s898_s2 + $0x14] sm:$0xf0]  ;;  %s706_s1 = smov [#allocation2]  }
  0x17   :  { %313 = vmatpush.bf16.msra.mxu1 %v645_v21  ;;  %v97_v43 = vpack.c.b16 %v93_v36, %v93_v36  ;;  %v98_v44 = vpack.c.b16 %v94_v37, %v94_v37  ;;  %v619_v48 = vld [vmem:[%s898_s2 + $0x20] sm:$0xf]  ;;  %v671_v50 = vld [vmem:[%s898_s2 + $0x24] sm:$0xf]  ;;  %v669_v56 = vld [vmem:[%s898_s2 + $0x14] sm:$0xf]  ;;  %v612_v57 = vor.u32 %v670_v55, %v611_v54 }
  0x18   :  { %326 = vmatpush.bf16.msra.mxu2 %v653_v22  ;;  %v620_v51 = vor.u32 %v672_v49, %v619_v48  ;;  %v624_v53 = vor.u32 %v671_v50, %v621_v52  ;;  %v613_v58 = vld [vmem:[%s898_s2 + $0x18] sm:$0xf0]  ;;  %v603_v60 = vld [vmem:[%s898_s2] sm:$0xf]  ;;  %v668_v61 = vld [vmem:[%s898_s2 + $0x4] sm:$0xf0] }
  0x19   :  { %339 = vmatpush.bf16.msra.mxu3 %v661_v23  ;;  %v616_v59 = vor.u32 %v669_v56, %v613_v58  ;;  %v667_v62 = vld [vmem:[%s898_s2 + $0x4] sm:$0xf]  ;;  %v604_v63 = vor.u32 %v668_v61, %v603_v60  ;;  %v605_v0 = vld [vmem:[%s898_s2 + $0x8] sm:$0xf0]  ;;  %v357_v17 = vld [vmem:[%s899_s3] sm:$0x3] }
  0x1a   :  { %301 = vmatpush.bf16.msra.mxu0 %v636_v24  ;;  %v608_v1 = vor.u32 %v667_v62, %v605_v0  ;;  %v24_v2 = vld [vmem:[%s900_s4] sm:$0xff]  ;;  %v359_v18 = vperm.slane %v357_v17, 0  ;;  %v360_v22 = vperm.slane %v357_v17, 1  ;;  %s462_s17 = sshll.u32 %s706_s1, 4  ;;  %s463_s17 = int_to_ptr.vmem [resolvable:$true] %s462_s17 }
  0x1b   :  { %314 = vmatpush.bf16.msra.mxu1 %v644_v25  ;;  %448 = vperm.xlu1 %677, %v24_v2  }
  0x1c   :  { %327 = vmatpush.bf16.msra.mxu2 %v652_v27 }
  0x1d   :  { %340 = vmatpush.bf16.msra.mxu3 %v660_v28 }
  0x1e   :  { %302 = vmatpush.bf16.msra.mxu0 %v635_v34 }
  0x1f   :  { %315 = vmatpush.bf16.msra.mxu1 %v643_v35 }
  0x20   :  { %328 = vmatpush.bf16.msra.mxu2 %v651_v38 }
  0x21   :  { %341 = vmatpush.bf16.msra.mxu3 %v659_v39  ;;  %303 = vmatmul.bf16.vlgmr.msra.gmra.mxu0 %v95_v41 }
  0x22   :  { %411 = vmatpush.bf16.msrb.mxu0 %v628_v40  ;;  %316 = vmatmul.bf16.vlgmr.msra.gmra.mxu1 %v96_v42 }
  0x23   :  { %329 = vmatmul.bf16.vlgmr.msra.gmra.mxu2 %v97_v43  ;;  %424 = vmatpush.bf16.msrb.mxu1 %v632_v47 }
  0x24   :  { %342 = vmatmul.bf16.vlgmr.msra.gmra.mxu3 %v98_v44 }
  0x26   :  { %412 = vmatpush.bf16.msrb.mxu0 %v620_v51 }
  0x27   :  { %425 = vmatpush.bf16.msrb.mxu1 %v624_v53 }
  0x2a   :  { %413 = vmatpush.bf16.msrb.mxu0 %v612_v57 }
  0x2b   :  { %426 = vmatpush.bf16.msrb.mxu1 %v616_v59 }
  0x2e   :  { %414 = vmatpush.bf16.msrb.mxu0 %v604_v63 }
  0x2f   :  { %427 = vmatpush.bf16.msrb.mxu1 %v608_v1 }
  0x8d   :  { %v449_v26 = vpop.permute.xlu1 %448 }
  0x9e   :  { %v304_v4 = vpop.f32.mrf.mxu0 }
  0x9f   :  { %v317_v5 = vpop.f32.mrf.mxu1 }
  0xa0   :  { %v318_v6 = vadd.f32 %v317_v5, %v304_v4 }
  0xa6   :  { %v330_v7 = vpop.f32.mrf.mxu2  ;;  %v306_v10 = vpop.f32.mrf.mxu0 }
  0xa7   :  { %v343_v8 = vpop.f32.mrf.mxu3  ;;  %v331_v9 = vadd.f32 %v330_v7, %v318_v6  ;;  %v319_v11 = vpop.f32.mrf.mxu1 }
  0xa9   :  { %v344_v12 = vadd.f32 %v343_v8, %v331_v9 }
  0xab   :  { %v347_v13 = vmax.f32 %v344_v12, 0.0 }
  0xad   :  { %v348_v14 = vpack.c.bf16 %v347_v13, %v347_v13 }
  0xae   :  { %v332_v15 = vpop.f32.mrf.mxu2 }
  0xaf   :  { %v345_v16 = vpop.f32.mrf.mxu3  ;;  %633 = vmatmul.msk.bf16.vlgmr.msrb.gmra.mxu0 %vm403_vm0, %v348_v14  ;;  %634 = vmatmul.msk.bf16.vlgmr.msrb.gmra.mxu1 %vm403_vm0, %v348_v14 }
 0x12c   :  { %v416_v19 = vpop.f32.mrf.mxu0  ;;  %v429_v20 = vpop.f32.mrf.mxu1 }
 0x12d   :  { %v417_v21 = vadd.f32 %v416_v19, %v359_v18  ;;  %v430_v25 = vadd.f32 %v429_v20, %v360_v22 }
 0x12f   :  { %433 = vadd.xlane.f32.xlu0 %v417_v21  ;;  %v451_v28 = vadd.f32 %v449_v26, %v417_v21  ;;  %v452_v32 = vadd.f32 %v449_v26, %v430_v25 }
 0x134   :  { %v418_v23 = vpop.f32.mrf.mxu0  ;;  %v431_v24 = vpop.f32.mrf.mxu1 }
 0x137   :  { %436 = vadd.xlane.f32.xlu0 %v430_v25 }
 0x1a2   :  { %v434_v27 = vpop.xlane.xlu0 %433 }
 0x1a3   :  { %v435_v29 = vmul.f32 0.125, %v434_v27 }
 0x1a5   :  { %v453_v30 = vsub.f32 %v451_v28, %v435_v29 }
 0x1a7   :  { %455 = vst [vmem:[#allocation2] sm:$0xff] %v453_v30 }
 0x1aa   :  { %v437_v31 = vpop.xlane.xlu0 %436 }
 0x1ab   :  { %v438_v33 = vmul.f32 0.125, %v437_v31 }
 0x1ad   :  { %v454_v34 = vsub.f32 %v452_v32, %v438_v33 }
 0x1af   :  { %456 = vst [vmem:[#allocation2 + $0x8] sm:$0xff] %v454_v34 }
 0x1b0   :  { %467 = dma.vmem_to_hbm [thread:$0]  %s463_s17, 256, %s465_s19, [#allocation3]  }
 0x1b1   :  { %703 = dma.done.wait [#allocation3], 256  }
 0x1b2   :  { %704 = vsyncadd [#allocation3], 4294967040 }
 0x1b3   :  { %472 = vsyncpa [#allocation3], 1 }

</bundles_post_ra>
